<compile_context>
chip_gen: v5e
topology: v5e:2x2
jax: 0.10.0
libtpu: 0.0.40
codegen_flags: <defaults>
</compile_context>

<pallas_src>
import functools
import math

import jax
import jax.numpy as jnp
from jax import lax
from jax.experimental import pallas as pl
from jax.experimental.pallas import tpu as pltpu


_LANE = 128
_NEG_BIG = -1e30  # effectively -inf for masked (padded) memory rows


def _round_up(n, m):
    return ((n + m - 1) // m) * m


def _tpu_vmem_bytes():
    """Physical VMEM per TensorCore (v5e/v6e: 128 MiB, v7x: 64 MiB)."""
    try:
        info = pltpu.get_tpu_info()
        for name in ("vmem_capacity_bytes", "vmem_bytes"):
            v = getattr(info, name, None)
            if v:
                return int(v)
    except Exception:
        pass
    return 64 * 1024 * 1024  # conservative fallback (v7x-sized)


_VMEM_BYTES = _tpu_vmem_bytes()
# Leave headroom under the physical capacity for double-buffering + compiler scratch.
_VMEM_LIMIT = max(32 * 1024 * 1024,
                  min(_VMEM_BYTES - 16 * 1024 * 1024, 100 * 1024 * 1024))

_COMPILER_PARAMS = pltpu.CompilerParams(
    dimension_semantics=("parallel", "parallel"),
    vmem_limit_bytes=_VMEM_LIMIT,
)


def _choose_tj(n_padded, requested=None):
    """Query-axis tile size, generation aware."""
    if requested is not None:
        tj_max = requested
    elif _VMEM_BYTES >= 128 * 1024 * 1024:
        tj_max = 1024            # v5e / v6e: largest tile that fits wins
    elif n_padded >= 2048:
        tj_max = 256             # v7x (64 MiB): keep (Np, TJ) f32 intermediates small
    else:
        tj_max = 512
    tj = min(tj_max, n_padded)
    while n_padded % tj:
        tj -= _LANE
    return max(tj, _LANE)


def _pad_last(x, n_padded):
    n = x.shape[-1]
    if n_padded == n:
        return x
    pad = [(0, 0)] * (x.ndim - 1) + [(0, n_padded - n)]
    return jnp.pad(x, pad)


def _augment_keys(Mk, Qk):
    """Hoisted (j-invariant) augmentation, done once per call in the wrapper:
       mk_aug = [ (2/sqrt(CK)) * Mk ; a_sq/sqrt(CK) ]   (B, CK+1, Np)
       qk_aug = [ Qk ; -1 ]                             (B, CK+1, Np)
    so that  mk_aug^T @ qk_aug == (2*Mk^T Qk - a_sq) / sqrt(CK)  in one MXU matmul."""
    B, CK, H, W = Mk.shape
    N = H * W
    Np = _round_up(N, _LANE)
    inv = 1.0 / math.sqrt(CK)
    mk = Mk.reshape(B, CK, N).astype(jnp.float32)
    qk = Qk.reshape(B, CK, N).astype(jnp.float32)
    a_sq = jnp.sum(mk * mk, axis=1, keepdims=True)                       # (B, 1, N)
    mk_aug = jnp.concatenate([mk * (2.0 * inv), a_sq * inv], axis=1)     # (B, CK+1, N)
    qk_aug = jnp.concatenate(
        [qk, jnp.full((B, 1, N), -1.0, jnp.float32)], axis=1)            # (B, CK+1, N)
    return _pad_last(mk_aug, Np), _pad_last(qk_aug, Np), N, Np


# ----------------------------- kernels ---------------------------------------


def _softmax_affinity_tile(mk_aug, qk_aug, *, n_valid, bf16_ops):
    """softmax over the memory axis for one query tile.
    mk_aug: (CK+1, Np), qk_aug: (CK+1, TJ) -> p: (Np, TJ) float32 (softmax over axis 0)."""
    n_total = mk_aug.shape[-1]
    if bf16_ops:
        lhs = mk_aug.astype(jnp.bfloat16)
        rhs = qk_aug.astype(jnp.bfloat16)
    else:
        lhs, rhs = mk_aug, qk_aug
    # Contract over the channel axis directly (no explicit transpose / relayout of mk).
    logits = lax.dot_general(
        lhs, rhs,
        dimension_numbers=(((0,), (0,)), ((), ())),
        preferred_element_type=jnp.float32)                              # (Np, TJ)
    if n_valid != n_total:  # static trace-time branch: mask padded memory rows
        row = lax.broadcasted_iota(jnp.int32, logits.shape, 0)
        logits = jnp.where(row < n_valid, logits, _NEG_BIG)
    m = jnp.max(logits, axis=0, keepdims=True)                           # (1, TJ)
    z = logits - m
    if bf16_ops:
        e = jnp.exp(z.astype(jnp.bfloat16))        # bf16 EUP exp (v6e/v7x)
        denom = jnp.sum(e.astype(jnp.float32), axis=0, keepdims=True)    # f32 accumulate
    else:
        e = jnp.exp(z)
        denom = jnp.sum(e, axis=0, keepdims=True)
    # One reciprocal per column (EUP) instead of an O(Np*TJ) VPU divide.
    return e * pl.reciprocal(denom, approx=False)                        # (Np, TJ) f32


def _attention_memory_kernel(mk_ref, qk_ref, out_ref, *, n_valid, bf16_ops):
    # mk_ref: (1, CK+1, Np), qk_ref: (1, CK+1, TJ), out_ref: (1, Np, TJ)
    p = _softmax_affinity_tile(mk_ref[0], qk_ref[0], n_valid=n_valid, bf16_ops=bf16_ops)
    out_ref[0] = p.astype(out_ref.dtype)


def _fused_readout_kernel(mk_ref, qk_ref, mv_ref, out_ref, *, n_valid, bf16_ops):
    # mk_ref: (1, CK+1, Np), qk_ref: (1, CK+1, TJ), mv_ref: (1, CV, Np), out: (1, CV, TJ)
    p = _softmax_affinity_tile(mk_ref[0], qk_ref[0], n_valid=n_valid, bf16_ops=bf16_ops)
    mm_dtype = jnp.bfloat16 if bf16_ops else jnp.float32
    out_ref[0] = lax.dot_general(
        mv_ref[0].astype(mm_dtype), p.astype(mm_dtype),
        dimension_numbers=(((1,), (0,)), ((), ())),
        preferred_element_type=jnp.float32).astype(out_ref.dtype)


def _readout_kernel(mv_ref, aff_ref, out_ref, *, bf16_ops):
    # mv_ref: (1, CV, Np), aff_ref: (1, Np, TJ), out_ref: (1, CV, TJ)
    mm_dtype = jnp.bfloat16 if bf16_ops else jnp.float32
    out_ref[0] = lax.dot_general(
        mv_ref[0].astype(mm_dtype), aff_ref[0].astype(mm_dtype),
        dimension_numbers=(((1,), (0,)), ((), ())),
        preferred_element_type=jnp.float32).astype(out_ref.dtype)


# ----------------------------- wrappers ---------------------------------------


def attention_memory_padded(Mk, Qk, *, out_dtype=jnp.float32, bf16_ops=False, tj=None):
    """Forward pass, padded interface.

    Returns (affinity_padded, n_valid) where affinity_padded is (B, Np, Np),
    Np = round_up(H*W, 128).  Padded memory rows (i >= n_valid) are exact zeros, so the
    padded array can be fed directly to attention_readout without any O(N^2) pad/slice
    copy; padded query columns are meaningless and should be trimmed/ignored.
    """
    B, CK, H, W = Mk.shape
    mk_aug, qk_aug, N, Np = _augment_keys(Mk, Qk)
    CA = CK + 1
    TJ = _choose_tj(Np, tj)

    out = pl.pallas_call(
        functools.partial(_attention_memory_kernel, n_valid=N, bf16_ops=bf16_ops),
        out_shape=jax.ShapeDtypeStruct((B, Np, Np), out_dtype),
        grid_spec=pltpu.PrefetchScalarGridSpec(
            num_scalar_prefetch=0,
            grid=(B, Np // TJ),
            in_specs=[
                pl.BlockSpec((1, CA, Np), lambda b, j: (b, 0, 0)),
                pl.BlockSpec((1, CA, TJ), lambda b, j: (b, 0, j)),
            ],
            out_specs=pl.BlockSpec((1, Np, TJ), lambda b, j: (b, 0, j)),
        ),
        compiler_params=_COMPILER_PARAMS,
    )(mk_aug, qk_aug)
    return out, N


def attention_memory(Mk, Qk, **kwargs):
    """Exact Pallas equivalent of AttentionMemory.forward: (B,CK,H,W) x 2 -> (B, N, N)."""
    out, n = attention_memory_padded(Mk, Qk, **kwargs)
    if out.shape[-1] != n:
        out = out[:, :n, :n]  # compat path only when N is not lane-aligned
    return out


def attention_readout(affinity, mv, *, out_dtype=jnp.float32, bf16_ops=False, tj=None):
    """Pallas equivalent of AttentionMemory.readout.

    `affinity` may be the exact (B, N, N) array or the padded (B, Np, Np) array from
    attention_memory_padded (preferred: avoids the extra O(N^2) HBM pad copy)."""
    B, CV, H, W = mv.shape
    N = H * W
    Np = _round_up(N, _LANE)
    TJ = _choose_tj(Np, tj)
    mv_flat = _pad_last(mv.reshape(B, CV, N), Np)
    if affinity.shape[-1] == Np:
        aff = affinity
    else:
        # compat path (exact-shape affinity with non-lane-aligned N): one O(N^2) pad.
        aff = jnp.pad(affinity, ((0, 0), (0, Np - N), (0, Np - N)))

    out = pl.pallas_call(
        functools.partial(_readout_kernel, bf16_ops=bf16_ops),
        out_shape=jax.ShapeDtypeStruct((B, CV, Np), out_dtype),
        grid_spec=pltpu.PrefetchScalarGridSpec(
            num_scalar_prefetch=0,
            grid=(B, Np // TJ),
            in_specs=[
                pl.BlockSpec((1, CV, Np), lambda b, j: (b, 0, 0)),
                pl.BlockSpec((1, Np, TJ), lambda b, j: (b, 0, j)),
            ],
            out_specs=pl.BlockSpec((1, CV, TJ), lambda b, j: (b, 0, j)),
        ),
        compiler_params=_COMPILER_PARAMS,
    )(mv_flat, aff)
    return out[:, :, :N].reshape(B, CV, H, W)


def attention_memory_readout(Mk, Qk, mv, *, out_dtype=jnp.float32, bf16_ops=False, tj=None):
    """Fused forward + readout: the (B, N, N) affinity never touches HBM."""
    B, CK, H, W = Mk.shape
    CV = mv.shape[1]
    mk_aug, qk_aug, N, Np = _augment_keys(Mk, Qk)
    CA = CK + 1
    TJ = _choose_tj(Np, tj)
    mv_flat = _pad_last(mv.reshape(B, CV, H * W), Np)

    out = pl.pallas_call(
        functools.partial(_fused_readout_kernel, n_valid=N, bf16_ops=bf16_ops),
        out_shape=jax.ShapeDtypeStruct((B, CV, Np), out_dtype),
        grid_spec=pltpu.PrefetchScalarGridSpec(
            num_scalar_prefetch=0,
            grid=(B, Np // TJ),
            in_specs=[
                pl.BlockSpec((1, CA, Np), lambda b, j: (b, 0, 0)),
                pl.BlockSpec((1, CA, TJ), lambda b, j: (b, 0, j)),
                pl.BlockSpec((1, CV, Np), lambda b, j: (b, 0, 0)),
            ],
            out_specs=pl.BlockSpec((1, CV, TJ), lambda b, j: (b, 0, j)),
        ),
        compiler_params=_COMPILER_PARAMS,
    )(mk_aug, qk_aug, mv_flat)
    return out[:, :, :N].reshape(B, CV, H, W)


# ----------------------------- reference & test --------------------------------


def _reference_forward(Mk, Qk):
    B, CK, H, W = Mk.shape
    N = H * W
    mk = Mk.reshape(B, CK, N).astype(jnp.float32)
    qk = Qk.reshape(B, CK, N).astype(jnp.float32)
    a_sq = jnp.sum(mk ** 2, axis=1)[:, :, None]                # (B, N, 1)
    ab = jnp.einsum("bci,bcj->bij", mk, qk)                    # (B, N, N)
    logits = (2.0 * ab - a_sq) / math.sqrt(CK)
    return jax.nn.softmax(logits, axis=1)


if __name__ == "__main__":
    B, CK, CV, H, W = 2, 4, 8, 16, 16
    key = jax.random.PRNGKey(0)
    k1, k2, k3 = jax.random.split(key, 3)
    Mk = jax.random.normal(k1, (B, CK, H, W), dtype=jnp.float32)
    Qk = jax.random.normal(k2, (B, CK, H, W), dtype=jnp.float32)
    mv = jax.random.normal(k3, (B, CV, H, W), dtype=jnp.float32)

    # forward: affinity
    affinity = jax.block_until_ready(attention_memory(Mk, Qk))
    ref_aff = _reference_forward(Mk, Qk)
    assert affinity.shape == (B, H * W, H * W)
    assert jnp.allclose(affinity, ref_aff, atol=1e-5, rtol=1e-5), "affinity mismatch"

    # readout from a materialized affinity
    read = jax.block_until_ready(attention_readout(affinity, mv))
    ref_read = jnp.einsum(
        "bcn,bnm->bcm", mv.reshape(B, CV, H * W), ref_aff).reshape(B, CV, H, W)
    assert jnp.allclose(read, ref_read, atol=1e-4, rtol=1e-4), "readout mismatch"

    # fused path (no (B, N, N) affinity in HBM)
    fused = jax.block_until_ready(attention_memory_readout(Mk, Qk, mv))
    assert jnp.allclose(fused, ref_read, atol=1e-4, rtol=1e-4), "fused readout mismatch"

    # fused low-precision path (bf16 MXU operands + bf16 exp): loose tolerance
    fused_bf16 = jax.block_until_ready(
        attention_memory_readout(Mk, Qk, mv, bf16_ops=True))
    d = jnp.abs(fused_bf16 - ref_read)
    assert float(jnp.mean(d)) < 5e-2 and float(jnp.max(d)) < 0.3, "bf16 fused mismatch"

    # non-lane-aligned spatial size exercises the pad + mask path (N = 144 -> 256)
    H2 = W2 = 12
    Mk2 = jax.random.normal(k1, (B, CK, H2, W2), dtype=jnp.float32)
    Qk2 = jax.random.normal(k2, (B, CK, H2, W2), dtype=jnp.float32)
    mv2 = jax.random.normal(k3, (B, CV, H2, W2), dtype=jnp.float32)
    ref2 = _reference_forward(Mk2, Qk2)
    aff2 = jax.block_until_ready(attention_memory(Mk2, Qk2))
    assert jnp.allclose(aff2, ref2, atol=1e-5, rtol=1e-5), "padded affinity mismatch"

    # padded interface end-to-end: no O(N^2) pad/slice copies between the two kernels
    aff2_padded, n2 = attention_memory_padded(Mk2, Qk2)
    read2 = jax.block_until_ready(attention_readout(aff2_padded, mv2))
    ref_read2 = jnp.einsum(
        "bcn,bnm->bcm", mv2.reshape(B, CV, n2), ref2).reshape(B, CV, H2, W2)
    assert jnp.allclose(read2, ref_read2, atol=1e-4, rtol=1e-4), "padded readout mismatch"

    print("KERNEL_OK")
</pallas_src>

<mosaic_0001>
module attributes {stable_mosaic.version = 11 : i64} {
  func.func @_attention_memory_kernel(%arg0: i32, %arg1: i32, %arg2: memref<1x5x256xf32, #tpu.memory_space<vmem>>, %arg3: memref<1x5x256xf32, #tpu.memory_space<vmem>>, %arg4: memref<1x256x256xf32, #tpu.memory_space<vmem>>) attributes {dimension_semantics = [#tpu.dimension_semantics<parallel>, #tpu.dimension_semantics<parallel>], iteration_bounds = array<i64: 2, 1>, scalar_prefetch = 0 : i64, scratch_operands = 0 : i64, tpu.core_type = #tpu.core_type<tc>, window_params = [{transform_indices = @transform_0, window_bounds = array<i64: 1, 5, 256>}, {transform_indices = @transform_1, window_bounds = array<i64: 1, 5, 256>}, {transform_indices = @transform_2, window_bounds = array<i64: 1, 256, 256>}]} {
    %c0 = arith.constant 0 : index
    %c0_0 = arith.constant 0 : index
    %c0_1 = arith.constant 0 : index
    %0 = vector.load %arg2[%c0, %c0_0, %c0_1] : memref<1x5x256xf32, #tpu.memory_space<vmem>>, vector<1x5x256xf32>
    %1 = vector.shape_cast %0 : vector<1x5x256xf32> to vector<5x256xf32>
    %c0_2 = arith.constant 0 : index
    %c0_3 = arith.constant 0 : index
    %c0_4 = arith.constant 0 : index
    %2 = vector.load %arg3[%c0_2, %c0_3, %c0_4] : memref<1x5x256xf32, #tpu.memory_space<vmem>>, vector<1x5x256xf32>
    %3 = vector.shape_cast %2 : vector<1x5x256xf32> to vector<5x256xf32>
    %cst = arith.constant dense<0.000000e+00> : vector<256x256xf32>
    %4 = tpu.matmul %1, %3, %cst {dimension_numbers = #tpu.dot_dimension_numbers<[0], [0], [1], [1], [0, 1, 1, 1], [], []>} : vector<5x256xf32>, vector<5x256xf32>, vector<256x256xf32> -> vector<256x256xf32>
    %cst_5 = arith.constant dense<0xFF800000> : vector<256xf32>
    %5 = vector.multi_reduction <maximumf>, %4, %cst_5 [0] : vector<256x256xf32> to vector<256xf32>
    %6 = vector.shape_cast %5 : vector<256xf32> to vector<1x256xf32>
    %7 = vector.broadcast %6 : vector<1x256xf32> to vector<256x256xf32>
    %8 = arith.subf %4, %7 : vector<256x256xf32>
    %9 = math.exp %8 : vector<256x256xf32>
    %cst_6 = arith.constant dense<0.000000e+00> : vector<256xf32>
    %10 = vector.multi_reduction <add>, %9, %cst_6 [0] : vector<256x256xf32> to vector<256xf32>
    %11 = vector.shape_cast %10 : vector<256xf32> to vector<1x256xf32>
    %12 = tpu.reciprocal %11 : vector<1x256xf32> -> vector<1x256xf32>
    %13 = vector.broadcast %12 : vector<1x256xf32> to vector<256x256xf32>
    %14 = arith.mulf %9, %13 : vector<256x256xf32>
    %c0_7 = arith.constant 0 : index
    %c0_8 = arith.constant 0 : index
    %c0_9 = arith.constant 0 : index
    %15 = vector.load %arg4[%c0_7, %c0_8, %c0_9] : memref<1x256x256xf32, #tpu.memory_space<vmem>>, vector<1x256x256xf32>
    %16 = vector.shape_cast %15 : vector<1x256x256xf32> to vector<256x256xf32>
    %17 = vector.shape_cast %14 : vector<256x256xf32> to vector<1x256x256xf32>
    tpu.vector_store %arg4[%c0_7, %c0_8, %c0_9], %17 {strides = array<i32>} : memref<1x256x256xf32, #tpu.memory_space<vmem>>, vector<1x256x256xf32>,
    return
  }
  func.func @transform_0(%arg0: i32, %arg1: i32) -> (i32, i32, i32) {
    %c0_i32 = arith.constant 0 : i32
    %c0_i32_0 = arith.constant 0 : i32
    %c0_i32_1 = arith.constant 0 : i32
    return %arg0, %c0_i32, %c0_i32_0 : i32, i32, i32
  }
  func.func @transform_1(%arg0: i32, %arg1: i32) -> (i32, i32, i32) {
    %c0_i32 = arith.constant 0 : i32
    %c0_i32_0 = arith.constant 0 : i32
    return %arg0, %c0_i32, %arg1 : i32, i32, i32
  }
  func.func @transform_2(%arg0: i32, %arg1: i32) -> (i32, i32, i32) {
    %c0_i32 = arith.constant 0 : i32
    %c0_i32_0 = arith.constant 0 : i32
    return %arg0, %c0_i32, %arg1 : i32, i32, i32
  }
}

</mosaic_0001>

<bundles_post_ra>
// kernel: tpu_custom_call.1
= control target key start
LH: loop header
LB: loop body
LE: loop exit
PB: predicated region body
PF: predicated region fallthrough
CT: control target
= control target key end

     0   :  { %7 = vsyncpa [#allocation3], 0  ;;  %s2380_s0 = inlined_call_operand.vmem [shape: f32[2,5,256], index: 0, kind: input, shape index: {}]   ;;  %s2381_s1 = inlined_call_operand.vmem [shape: f32[2,5,256], index: 1, kind: input, shape index: {}]   ;;  %s2382_s2 = inlined_call_operand.hbm [shape: f32[2,256,256], index: 2, kind: output, shape index: {}]  }
   0x1   :  { %9 = vsyncpa [#allocation3 + $0x1], 0  ;;  %s1569_s9 = smov 0   ;;  %s1571_s10 = smov 0  }
   0x2   :  { %s1573_s11 = smov 0   ;;  %s1575_s12 = smov 0  }
   0x3   :  { %s1577_s13 = smov 0   ;;  %s1579_s14 = smov 0  }
   0x4 LB: > { %s1196_s15 = sadd.s32 4294967295, %s1550_s14   ;;  %s1197_s16 = sadd.s32 4294967294, %s1550_s14   ;;  %s1550_s14 = sphi %s1579_s14, %s15_s14   ;;  %s1546_s13 = sphi %s1577_s13, %s2485_s13   ;;  %s1542_s12 = sphi %s1575_s12, %s2484_s12   ;;  %s1538_s11 = sphi %s1573_s11, %s2483_s11   ;;  %s1534_s10 = sphi %s1571_s10, %s2482_s10   ;;  %s1530_s9 = sphi %s1569_s9, %s2481_s9  }
   0x5   : > { %s27_s17 = sadd.s32 1, %s1546_s13  ;;  %s90_s18 = sadd.s32 1, %s1538_s11 }
   0x6   : > { %p29_p0 = scmp.ge.s32.totalorder %s27_s17, 2  ;;  %p100_p1 = scmp.ne.s32.totalorder %s1538_s11, %s1534_s10 }
   0x7   : > { %p101_p2 = scmp.eq.s32.totalorder %s1196_s15, 1  ;;  %p106_p3 = scmp.ne.s32.totalorder %s1534_s10, %s1530_s9 }
   0x8   : > { %s2487_s17 = smov (%p29_p0, %s27_s17), 0  ;;  %p107_p5 = scmp.eq.s32.totalorder %s1197_s16, 1 }
   0x9   : > { %p1609_p4 = por %p101_p2, %p100_p1  ;;  %s85_s20 = ssub.s32 %s1546_s13, %s2487_s17 }
   0xa   : > { %p1200_p6 = scmp.ge.s32.totalorder %s1550_s14, 1  ;;  %p88_p7 = scmp.eq.s32.totalorder %s85_s20, 0 }
   0xb   : > { %p1616_p8 = por %p107_p5, %p106_p3  ;;  %p146_p9 = scmp.lt.s32.totalorder %s1550_s14, 3 }
   0xc   : > { %s1622_s22 = scalar_select %p88_p7, %s1538_s11, %s90_s18  }
   0xd   : > { %p147_p10 = pnand %p1200_p6, %p146_p9 }
   0xf   : > { %150 = sbr.rel (%p147_p10) target bundleno = 767 (0x2ff), region = 28 }
  0x14   : > { %p177_p11 = scmp.lt.s32.totalorder %s1542_s12, 1  ;;  %vm358_vm0 = vcmask 1044480   ;;  %vm261_vm1 = vcmask 39936   ;;  %s174_s3 = sand.u32 1, %s1534_s10  }
  0x15   : > { %s1201_s4 = sshll.u32 %s174_s3, 9  ;;  %s1279_s6 = sshll.u32 %s1542_s12, 9 }
  0x16   : > { %s178_s23 = scalar_select %p177_p11, %s1542_s12, 1 }
  0x17   : > { %s2212_s5 = scalar_lea.vmem [#allocation2], %s1201_s4  ;;  %s1101_s15 = scalar_lea.hbm %s2382_s2, %s1279_s6 }
  0x18   : > { %s1277_s24 = sshll.u32 %s178_s23, 4  ;;  %s1102_s16 = sshll.u32 %s2212_s5, 4  ;;  %s1103_s16 = int_to_ptr.vmem [resolvable:$true] %s1102_s16 }
  0x19   : > { %s181_s27 = scalar_lea.vmem %s2380_s0, %s1277_s24  ;;  %s190_s30 = scalar_lea.vmem %s2381_s1, %s1277_s24 }
  0x1a   : > { %v193_v0 = vld [vmem:[%s181_s27] sm:$0x1f]  ;;  %v196_v2 = vld [vmem:[%s190_s30 + $0x8] sm:$0x1f]  ;;  %s1104_s18 = sshll.u32 %s1101_s15, 4  ;;  %s1088_s12 = scalar_lea.sflag [#allocation3], %s174_s3  ;;  %s1105_s18 = int_to_ptr.hbm [resolvable:$true] %s1104_s18 }
  0x1b   : > { %197 = vxpose.xlu0.b32.start.end [1/1] (short) %v193_v0, 128  ;;  %v195_v1 = vld [vmem:[%s190_s30] sm:$0x1f]  ;;  %1239 = vmatpush.msk.msra.mxu1 %vm358_vm0, %v196_v2  ;;  %v194_v3 = vld [vmem:[%s181_s27 + $0x8] sm:$0x1f]  ;;  %s1486_s20 = sshra.s32 %s1105_s18, 4  ;;  %s1492_s26 = scalar_lea.hbm %s2382_s2, 1024  ;;  %s1487_s20 = int_to_ptr.hbm [resolvable:$true] %s1486_s20 }
  0x1c   : > { %1206 = vmatpush.msk.msra.mxu0 %vm358_vm0, %v195_v1  ;;  %1280 = vmatpush.msk.msra.mxu2 %vm358_vm0, %v195_v1  ;;  %s1488_s23 = scalar_lea.hbm %s1487_s20, 512  ;;  %p1493_p1 = scmp.lt.s32.totalorder %s1487_s20, %s2382_s2 }
  0x1d   : > { %1281 = vmatpush.msk.msra.mxu3 %vm358_vm0, %v196_v2  ;;  %p1489_p12 = scmp.ne.s32.totalorder %s1487_s20, %s1488_s23  ;;  %p1494_p2 = scmp.lt.s32.totalorder %s1492_s26, %s1488_s23 }
  0x1f   : > { %p1490_p13 = pnand %p1489_p12, %p1609_p4  ;;  %p1495_p3 = por %p1494_p2, %p1493_p1 }
  0x21   : > { %p1491_p0 = pneg %p1490_p13 }
  0x23   : > { %p1496_p5 = pnand %p1495_p3, %p1491_p0 }
  0x9b   : > { %229 = vxpose.xlu0.b32.start.end [1/1] (short) %v194_v3, 128 }
  0xbf   : > { %v213_v4 = vpop.trf.xlu0 }
  0xc0   : > { %1207 = vmatmul.msk.f32.vlgmr.msra.gmra.mxu0 %vm261_vm1, %v213_v4  ;;  %1240 = vmatmul.msk.f32.vlgmr.msra.gmra.mxu1 %vm261_vm1, %v213_v4 }
  0xc7   : > { %v214_v5 = vpop.trf.xlu0 }
  0xc8   : > { %1208 = vmatmul.msk.f32.gmra.mxu0 %vm261_vm1, %v214_v5  ;;  %1241 = vmatmul.msk.f32.gmra.mxu1 %vm261_vm1, %v214_v5 }
  0xcf   : > { %v215_v6 = vpop.trf.xlu0 }
  0xd0   : > { %1209 = vmatmul.msk.f32.gmra.mxu0 %vm261_vm1, %v215_v6  ;;  %1242 = vmatmul.msk.f32.gmra.mxu1 %vm261_vm1, %v215_v6 }
  0xd7   : > { %v216_v7 = vpop.trf.xlu0 }
  0xd8   : > { %1210 = vmatmul.msk.f32.gmra.mxu0 %vm261_vm1, %v216_v7  ;;  %1243 = vmatmul.msk.f32.gmra.mxu1 %vm261_vm1, %v216_v7 }
  0xdf   : > { %v217_v8 = vpop.trf.xlu0 }
  0xe0   : > { %1211 = vmatmul.msk.f32.gmra.mxu0 %vm261_vm1, %v217_v8  ;;  %1244 = vmatmul.msk.f32.gmra.mxu1 %vm261_vm1, %v217_v8 }
  0xe7   : > { %v218_v9 = vpop.trf.xlu0 }
  0xe8   : > { %1212 = vmatmul.msk.f32.gmra.mxu0 %vm261_vm1, %v218_v9  ;;  %1245 = vmatmul.msk.f32.gmra.mxu1 %vm261_vm1, %v218_v9 }
  0xef   : > { %v219_v10 = vpop.trf.xlu0 }
  0xf0   : > { %1213 = vmatmul.msk.f32.gmra.mxu0 %vm261_vm1, %v219_v10  ;;  %1246 = vmatmul.msk.f32.gmra.mxu1 %vm261_vm1, %v219_v10 }
  0xf7   : > { %v220_v11 = vpop.trf.xlu0 }
  0xf8   : > { %1214 = vmatmul.msk.f32.gmra.mxu0 %vm261_vm1, %v220_v11  ;;  %1247 = vmatmul.msk.f32.gmra.mxu1 %vm261_vm1, %v220_v11 }
  0xff   : > { %v221_v12 = vpop.trf.xlu0 }
 0x100   : > { %1215 = vmatmul.msk.f32.gmra.mxu0 %vm261_vm1, %v221_v12  ;;  %1248 = vmatmul.msk.f32.gmra.mxu1 %vm261_vm1, %v221_v12 }
 0x107   : > { %v222_v13 = vpop.trf.xlu0 }
 0x108   : > { %1216 = vmatmul.msk.f32.gmra.mxu0 %vm261_vm1, %v222_v13  ;;  %1249 = vmatmul.msk.f32.gmra.mxu1 %vm261_vm1, %v222_v13 }
 0x10f   : > { %v223_v14 = vpop.trf.xlu0 }
 0x110   : > { %1217 = vmatmul.msk.f32.gmra.mxu0 %vm261_vm1, %v223_v14  ;;  %1250 = vmatmul.msk.f32.gmra.mxu1 %vm261_vm1, %v223_v14 }
 0x117   : > { %v224_v15 = vpop.trf.xlu0 }
 0x118   : > { %1218 = vmatmul.msk.f32.gmra.mxu0 %vm261_vm1, %v224_v15  ;;  %1251 = vmatmul.msk.f32.gmra.mxu1 %vm261_vm1, %v224_v15 }
 0x11f   : > { %v225_v16 = vpop.trf.xlu0 }
 0x120   : > { %1219 = vmatmul.msk.f32.gmra.mxu0 %vm261_vm1, %v225_v16  ;;  %1252 = vmatmul.msk.f32.gmra.mxu1 %vm261_vm1, %v225_v16 }
 0x127   : > { %v226_v17 = vpop.trf.xlu0 }
 0x128   : > { %1220 = vmatmul.msk.f32.gmra.mxu0 %vm261_vm1, %v226_v17  ;;  %1253 = vmatmul.msk.f32.gmra.mxu1 %vm261_vm1, %v226_v17 }
 0x12f   : > { %v227_v18 = vpop.trf.xlu0 }
 0x130   : > { %1221 = vmatmul.msk.f32.gmra.mxu0 %vm261_vm1, %v227_v18  ;;  %1254 = vmatmul.msk.f32.gmra.mxu1 %vm261_vm1, %v227_v18 }
 0x137   : > { %v228_v19 = vpop.trf.xlu0 }
 0x138   : > { %1222 = vmatmul.msk.f32.gmra.mxu0 %vm261_vm1, %v228_v19  ;;  %1255 = vmatmul.msk.f32.gmra.mxu1 %vm261_vm1, %v228_v19 }
 0x13d   : > { %v1686_v31 = vpop.f32.mrf.mxu0  ;;  %v1694_v35 = vpop.f32.mrf.mxu1 }
 0x13f   : > { %v245_v20 = vpop.trf.xlu0 }
 0x140   : > { %1223 = vmatmul.msk.f32.vlgmr.msra.gmra.mxu2 %vm261_vm1, %v245_v20  ;;  %1256 = vmatmul.msk.f32.vlgmr.msra.gmra.mxu3 %vm261_vm1, %v245_v20 }
 0x145   : > { %v1690_v33 = vpop.f32.mrf.mxu0  ;;  %v1700_v38 = vpop.f32.mrf.mxu1 }
 0x147   : > { %v246_v21 = vpop.trf.xlu0 }
 0x148   : > { %1224 = vmatmul.msk.f32.gmra.mxu2 %vm261_vm1, %v246_v21  ;;  %1257 = vmatmul.msk.f32.gmra.mxu3 %vm261_vm1, %v246_v21 }
 0x14d   : > { %v1696_v36 = vpop.f32.mrf.mxu0  ;;  %v1706_v42 = vpop.f32.mrf.mxu1 }
 0x14f   : > { %v247_v22 = vpop.trf.xlu0 }
 0x150   : > { %1225 = vmatmul.msk.f32.gmra.mxu2 %vm261_vm1, %v247_v22  ;;  %1258 = vmatmul.msk.f32.gmra.mxu3 %vm261_vm1, %v247_v22 }
 0x155   : > { %v1702_v40 = vpop.f32.mrf.mxu0  ;;  %v1712_v44 = vpop.f32.mrf.mxu1 }
 0x156   : > { %2418 = vst [vmem:[#allocation6_spill] sm:$0xff] %v1712_v44 }
 0x157   : > { %v248_v23 = vpop.trf.xlu0 }
 0x158   : > { %1226 = vmatmul.msk.f32.gmra.mxu2 %vm261_vm1, %v248_v23  ;;  %1259 = vmatmul.msk.f32.gmra.mxu3 %vm261_vm1, %v248_v23  ;;  %v591_v23 = vmax.f32 %v1686_v31, %v1696_v36 }
 0x15d   : > { %v1710_v43 = vpop.f32.mrf.mxu0  ;;  %v1724_v50 = vpop.f32.mrf.mxu1 }
 0x15e   : > { %2417 = vst [vmem:[#allocation5_spill] sm:$0xff] %v1710_v43 }
 0x15f   : > { %v249_v24 = vpop.trf.xlu0 }
 0x160   : > { %1227 = vmatmul.msk.f32.gmra.mxu2 %vm261_vm1, %v249_v24  ;;  %1260 = vmatmul.msk.f32.gmra.mxu3 %vm261_vm1, %v249_v24  ;;  %v592_v24 = vmax.f32 %v1690_v33, %v1702_v40 }
 0x165   : > { %v1718_v47 = vpop.f32.mrf.mxu0  ;;  %v1732_v54 = vpop.f32.mrf.mxu1 }
 0x166   : > { %2419 = vst [vmem:[#allocation7_spill] sm:$0xff] %v1718_v47 }
 0x167   : > { %v250_v25 = vpop.trf.xlu0 }
 0x168   : > { %1228 = vmatmul.msk.f32.gmra.mxu2 %vm261_vm1, %v250_v25  ;;  %1261 = vmatmul.msk.f32.gmra.mxu3 %vm261_vm1, %v250_v25  ;;  %v593_v25 = vmax.f32 %v591_v23, %v1710_v43 }
 0x16d   : > { %v1726_v51 = vpop.f32.mrf.mxu0  ;;  %v1740_v58 = vpop.f32.mrf.mxu1 }
 0x16f   : > { %v251_v26 = vpop.trf.xlu0 }
 0x170   : > { %1229 = vmatmul.msk.f32.gmra.mxu2 %vm261_vm1, %v251_v26  ;;  %1262 = vmatmul.msk.f32.gmra.mxu3 %vm261_vm1, %v251_v26  ;;  %v594_v26 = vmax.f32 %v592_v24, %v1718_v47 }
 0x175   : > { %v1734_v55 = vpop.f32.mrf.mxu0  ;;  %v1748_v62 = vpop.f32.mrf.mxu1 }
 0x177   : > { %v252_v27 = vpop.trf.xlu0 }
 0x178   : > { %1230 = vmatmul.msk.f32.gmra.mxu2 %vm261_vm1, %v252_v27  ;;  %1263 = vmatmul.msk.f32.gmra.mxu3 %vm261_vm1, %v252_v27 }
 0x17d   : > { %v1742_v59 = vpop.f32.mrf.mxu0  ;;  %v1760_v4 = vpop.f32.mrf.mxu1 }
 0x17f   : > { %v253_v28 = vpop.trf.xlu0 }
 0x180   : > { %1231 = vmatmul.msk.f32.gmra.mxu2 %vm261_vm1, %v253_v28  ;;  %1264 = vmatmul.msk.f32.gmra.mxu3 %vm261_vm1, %v253_v28 }
 0x185   : > { %v1754_v1 = vpop.f32.mrf.mxu0  ;;  %v1768_v8 = vpop.f32.mrf.mxu1 }
 0x187   : > { %v254_v29 = vpop.trf.xlu0 }
 0x188   : > { %1232 = vmatmul.msk.f32.gmra.mxu2 %vm261_vm1, %v254_v29  ;;  %1265 = vmatmul.msk.f32.gmra.mxu3 %vm261_vm1, %v254_v29  ;;  %v595_v29 = vmax.f32 %v593_v25, %v1726_v51 }
 0x18d   : > { %v1762_v5 = vpop.f32.mrf.mxu0  ;;  %v1776_v12 = vpop.f32.mrf.mxu1 }
 0x18e   : > { %2425 = vst [vmem:[#allocation13_spill] sm:$0xff] %v1762_v5 }
 0x18f   : > { %v255_v30 = vpop.trf.xlu0 }
 0x190   : > { %1233 = vmatmul.msk.f32.gmra.mxu2 %vm261_vm1, %v255_v30  ;;  %1266 = vmatmul.msk.f32.gmra.mxu3 %vm261_vm1, %v255_v30  ;;  %v596_v30 = vmax.f32 %v594_v26, %v1734_v55 }
 0x195   : > { %v1770_v9 = vpop.f32.mrf.mxu0  ;;  %v1784_v16 = vpop.f32.mrf.mxu1 }
 0x196   : > { %2426 = vst [vmem:[#allocation14_spill] sm:$0xff] %v1770_v9 }
 0x197   : > { %v256_v32 = vpop.trf.xlu0  ;;  %2428 = vst [vmem:[#allocation16_spill] sm:$0xff] %v1784_v16 }
 0x198   : > { %1234 = vmatmul.msk.f32.gmra.mxu2 %vm261_vm1, %v256_v32  ;;  %1267 = vmatmul.msk.f32.gmra.mxu3 %vm261_vm1, %v256_v32  ;;  %v597_v32 = vmax.f32 %v595_v29, %v1742_v59 }
 0x19d   : > { %v1778_v13 = vpop.f32.mrf.mxu0  ;;  %v1794_v21 = vpop.f32.mrf.mxu1 }
 0x19f   : > { %v257_v34 = vpop.trf.xlu0 }
 0x1a0   : > { %1235 = vmatmul.msk.f32.gmra.mxu2 %vm261_vm1, %v257_v34  ;;  %1268 = vmatmul.msk.f32.gmra.mxu3 %vm261_vm1, %v257_v34  ;;  %v598_v34 = vmax.f32 %v596_v30, %v1754_v1 }
 0x1a5   : > { %v1788_v18 = vpop.f32.mrf.mxu0 }
 0x1a7   : > { %v258_v37 = vpop.trf.xlu0 }
 0x1a8   : > { %1236 = vmatmul.msk.f32.gmra.mxu2 %vm261_vm1, %v258_v37  ;;  %1269 = vmatmul.msk.f32.gmra.mxu3 %vm261_vm1, %v258_v37  ;;  %v1812_v37 = vpop.f32.mrf.mxu1 }
 0x1a9   : > { %2430 = vst [vmem:[#allocation18_spill] sm:$0xff] %v1812_v37 }
 0x1ad   : > { %v1796_v22 = vpop.f32.mrf.mxu0 }
 0x1af   : > { %v259_v39 = vpop.trf.xlu0 }
 0x1b0   : > { %1237 = vmatmul.msk.f32.gmra.mxu2 %vm261_vm1, %v259_v39  ;;  %1270 = vmatmul.msk.f32.gmra.mxu3 %vm261_vm1, %v259_v39  ;;  %v599_v39 = vmax.f32 %v597_v32, %v1762_v5  ;;  %v1830_v5 = vpop.f32.mrf.mxu1 }
 0x1b2   : > { %v601_v24 = vmax.f32 %v599_v39, %v1778_v13  ;;  %v629_v39 = vmax.f32 %v1700_v38, %v1712_v44 }
 0x1b4   : > { %v603_v25 = vmax.f32 %v601_v24, %v1796_v22 }
 0x1b5   : > { %v1816_v23 = vpop.f32.mrf.mxu0 }
 0x1b7   : > { %v260_v41 = vpop.trf.xlu0 }
 0x1b8   : > { %1238 = vmatmul.msk.f32.gmra.mxu2 %vm261_vm1, %v260_v41  ;;  %1271 = vmatmul.msk.f32.gmra.mxu3 %vm261_vm1, %v260_v41  ;;  %v600_v41 = vmax.f32 %v598_v34, %v1770_v9 }
 0x1ba   : > { %v602_v47 = vmax.f32 %v600_v41, %v1788_v18 }
 0x1bc   : > { %v604_v26 = vmax.f32 %v602_v47, %v1816_v23 }
 0x1c3   : > { %v1714_v45 = vpop.f32.mrf.mxu2  ;;  %v1716_v46 = vpop.f32.mrf.mxu3 }
 0x1c4   : > { %v605_v30 = vmax.f32 %v603_v25, %v1714_v45  ;;  %v628_v25 = vmax.f32 %v1694_v35, %v1706_v42 }
 0x1cb   : > { %v1720_v48 = vpop.f32.mrf.mxu2  ;;  %v1722_v49 = vpop.f32.mrf.mxu3 }
 0x1cc   : > { %2420 = vst [vmem:[#allocation8_spill] sm:$0xff] %v1722_v49  ;;  %v606_v32 = vmax.f32 %v604_v26, %v1720_v48  ;;  %v631_v26 = vmax.f32 %v629_v39, %v1732_v54 }
 0x1d3   : > { %v1728_v52 = vpop.f32.mrf.mxu2  ;;  %v1730_v53 = vpop.f32.mrf.mxu3 }
 0x1d4   : > { %2421 = vst [vmem:[#allocation9_spill] sm:$0xff] %v1728_v52  ;;  %v607_v34 = vmax.f32 %v605_v30, %v1728_v52  ;;  %v633_v52 = vmax.f32 %v631_v26, %v1748_v62 }
 0x1db   : > { %v1736_v56 = vpop.f32.mrf.mxu2  ;;  %v1738_v57 = vpop.f32.mrf.mxu3 }
 0x1dc   : > { %2422 = vst [vmem:[#allocation10_spill] sm:$0xff] %v1736_v56  ;;  %v608_v9 = vmax.f32 %v606_v32, %v1736_v56  ;;  %v630_v56 = vmax.f32 %v628_v25, %v1724_v50 }
 0x1e3   : > { %v1744_v60 = vpop.f32.mrf.mxu2  ;;  %v1746_v61 = vpop.f32.mrf.mxu3 }
 0x1e4   : > { %2423 = vst [vmem:[#allocation11_spill] sm:$0xff] %v1744_v60  ;;  %v609_v41 = vmax.f32 %v607_v34, %v1744_v60  ;;  %v635_v60 = vmax.f32 %v633_v52, %v1768_v8 }
 0x1e6   : > { %v637_v25 = vmax.f32 %v635_v60, %v1784_v16 }
 0x1e8   : > { %v639_v52 = vmax.f32 %v637_v25, %v1812_v37 }
 0x1eb   : > { %v1750_v63 = vpop.f32.mrf.mxu2  ;;  %v1752_v0 = vpop.f32.mrf.mxu3 }
 0x1ec   : > { %2424 = vst [vmem:[#allocation12_spill] sm:$0xff] %v1750_v63  ;;  %v610_v24 = vmax.f32 %v608_v9, %v1750_v63  ;;  %v632_v63 = vmax.f32 %v630_v56, %v1740_v58 }
 0x1f3   : > { %v1756_v2 = vpop.f32.mrf.mxu2  ;;  %v1758_v3 = vpop.f32.mrf.mxu3 }
 0x1f4   : > { %v611_v30 = vmax.f32 %v609_v41, %v1756_v2 }
 0x1fb   : > { %v1764_v6 = vpop.f32.mrf.mxu2  ;;  %v1766_v7 = vpop.f32.mrf.mxu3 }
 0x1fc   : > { %v612_v32 = vmax.f32 %v610_v24, %v1764_v6  ;;  %v634_v24 = vmax.f32 %v632_v63, %v1760_v4 }
 0x1fe   : > { %v636_v56 = vmax.f32 %v634_v24, %v1776_v12 }
 0x200   : > { %v638_v63 = vmax.f32 %v636_v56, %v1794_v21 }
 0x203   : > { %v1772_v10 = vpop.f32.mrf.mxu2  ;;  %v1774_v11 = vpop.f32.mrf.mxu3 }
 0x204   : > { %2427 = vst [vmem:[#allocation15_spill] sm:$0xff] %v1772_v10  ;;  %v613_v44 = vmax.f32 %v611_v30, %v1772_v10  ;;  %v1857_v10 = vpop.f32.mrf.mxu1 }
 0x205   : > { %v641_v60 = vmax.f32 %v639_v52, %v1857_v10 }
 0x20b   : > { %v1780_v14 = vpop.f32.mrf.mxu2  ;;  %v1782_v15 = vpop.f32.mrf.mxu3 }
 0x20c   : > { %v614_v34 = vmax.f32 %v612_v32, %v1780_v14 }
 0x213   : > { %v1786_v17 = vpop.f32.mrf.mxu2  ;;  %v1790_v19 = vpop.f32.mrf.mxu3 }
 0x214   : > { %v615_v39 = vmax.f32 %v613_v44, %v1786_v17 }
 0x21b   : > { %v1792_v20 = vpop.f32.mrf.mxu2  ;;  %v1804_v27 = vpop.f32.mrf.mxu3 }
 0x21c   : > { %v616_v41 = vmax.f32 %v614_v34, %v1792_v20 }
 0x223   : > { %v1806_v28 = vpop.f32.mrf.mxu2  ;;  %v1824_v29 = vpop.f32.mrf.mxu3 }
 0x224   : > { %2429 = vst [vmem:[#allocation17_spill] sm:$0xff] %v1806_v28  ;;  %v617_v26 = vmax.f32 %v615_v39, %v1806_v28  ;;  %v640_v39 = vmax.f32 %v638_v63, %v1830_v5 }
 0x226   : > { %v642_v24 = vmax.f32 %v640_v39, %v1716_v46 }
 0x22b   : > { %v1820_v43 = vpop.f32.mrf.mxu2  ;;  %v1847_v9 = vpop.f32.mrf.mxu3 }
 0x22c   : > { %2431 = vst [vmem:[#allocation19_spill] sm:$0xff] %v1820_v43  ;;  %v618_v30 = vmax.f32 %v616_v41, %v1820_v43  ;;  %v643_v41 = vmax.f32 %v641_v60, %v1722_v49 }
 0x22e   : > { %v645_v25 = vmax.f32 %v643_v41, %v1738_v57 }
 0x233   : > { %v1836_v47 = vpop.f32.mrf.mxu2  ;;  %v1869_v28 = vpop.f32.mrf.mxu3 }
 0x234   : > { %v619_v44 = vmax.f32 %v617_v26, %v1836_v47  ;;  %v644_v26 = vmax.f32 %v642_v24, %v1730_v53 }
 0x236   : > { %v646_v52 = vmax.f32 %v644_v26, %v1746_v61 }
 0x238   : > { %v648_v63 = vmax.f32 %v646_v52, %v1758_v3 }
 0x23a   : > { %v650_v39 = vmax.f32 %v648_v63, %v1774_v11 }
 0x23b   : > { %v1859_v32 = vpop.f32.mrf.mxu2 }
 0x23c   : > { %v620_v34 = vmax.f32 %v618_v30, %v1859_v32  ;;  %v647_v30 = vmax.f32 %v645_v25, %v1752_v0 }
 0x23e   : > { %v621_v16 = vmax.f32 %v619_v44, %v620_v34  ;;  %v649_v44 = vmax.f32 %v647_v30, %v1766_v7 }
 0x240   : > { %v622_v43 = vrot.slane %v621_v16, 4  ;;  %v651_v60 = vmax.f32 %v649_v44, %v1782_v15 }
 0x242   : > { %v623_v37 = vmax.f32 %v621_v16, %v622_v43  ;;  %v653_v41 = vmax.f32 %v651_v60, %v1804_v27  ;;  %v1881_v43 = vpop.f32.mrf.mxu3  ;;  %v652_v16 = vmax.f32 %v650_v39, %v1790_v19  ;;  %v2432_v39 = vld [vmem:[#allocation5_spill] sm:$0xff] }
 0x244   : > { %v624_v56 = vrot.slane %v623_v37, 2  ;;  %v655_v24 = vmax.f32 %v653_v41, %v1847_v9  ;;  %v654_v26 = vmax.f32 %v652_v16, %v1824_v29 }
 0x246   : > { %v625_v34 = vmax.f32 %v623_v37, %v624_v56  ;;  %v657_v37 = vmax.f32 %v655_v24, %v1881_v43  ;;  %v656_v30 = vmax.f32 %v654_v26, %v1869_v28 }
 0x248   : > { %v626_v49 = vrot.slane %v625_v34, 1  ;;  %v658_v63 = vmax.f32 %v656_v30, %v657_v37 }
 0x24a   : > { %v1885_v25 = vmax.f32 %v625_v34, %v626_v49  ;;  %v659_v24 = vrot.slane %v658_v63, 4 }
 0x24c   : > { %v665_v56 = vsub.f32 %v1686_v31, %v1885_v25  ;;  %v667_v52 = vsub.f32 %v1690_v33, %v1885_v25  ;;  %v669_v44 = vsub.f32 %v1696_v36, %v1885_v25  ;;  %v671_v49 = vsub.f32 %v1702_v40, %v1885_v25  ;;  %v2433_v31 = vld [vmem:[#allocation7_spill] sm:$0xff] }
 0x24d   : > { %v673_v41 = vsub.f32 %v2432_v39, %v1885_v25  ;;  %v675_v26 = vsub.f32 %v2433_v31, %v1885_v25  ;;  %v677_v36 = vsub.f32 %v1726_v51, %v1885_v25  ;;  %v660_v30 = vmax.f32 %v658_v63, %v659_v24  ;;  %v2435_v24 = vld [vmem:[#allocation13_spill] sm:$0xff] }
 0x24e   : > { %v729_v34 = vmul.f32 1.442695, %v665_v56  ;;  %v733_v60 = vmul.f32 1.442695, %v667_v52  ;;  %v737_v16 = vmul.f32 1.442695, %v669_v44  ;;  %v679_v40 = vsub.f32 %v1734_v55, %v1885_v25 }
 0x24f   : > { %v741_v33 = vmul.f32 1.442695, %v671_v49  ;;  %v745_v37 = vmul.f32 1.442695, %v673_v41  ;;  %v749_v56 = vmul.f32 1.442695, %v675_v26  ;;  %v683_v55 = vsub.f32 %v1754_v1, %v1885_v25 }
 0x250   : > { %1340 = vpow2.f32 %v729_v34  ;;  %v681_v34 = vsub.f32 %v1742_v59, %v1885_v25  ;;  %v753_v49 = vmul.f32 1.442695, %v677_v36  ;;  %v757_v63 = vmul.f32 1.442695, %v679_v40 }
 0x251   : > { %1342 = vpow2.f32 %v733_v60  ;;  %v661_v60 = vrot.slane %v660_v30, 2  ;;  %v685_v59 = vsub.f32 %v2435_v24, %v1885_v25  ;;  %v765_v1 = vmul.f32 1.442695, %v683_v55 }
 0x252   : > { %1344 = vpow2.f32 %v737_v16  ;;  %v761_v31 = vmul.f32 1.442695, %v681_v34 }
 0x253   : > { %1346 = vpow2.f32 %v741_v33  ;;  %v662_v33 = vmax.f32 %v660_v30, %v661_v60  ;;  %v691_v60 = vsub.f32 %v1788_v18, %v1885_v25  ;;  %v695_v18 = vsub.f32 %v1816_v23, %v1885_v25 }
 0x254   : > { %1348 = vpow2.f32 %v745_v37  ;;  %v2436_v37 = vld [vmem:[#allocation14_spill] sm:$0xff] }
 0x255   : > { %1350 = vpow2.f32 %v749_v56 }
 0x256   : > { %v1906_v52 = vpop.eup %1340  ;;  %1352 = vpow2.f32 %v753_v49  ;;  %v769_v49 = vmul.f32 1.442695, %v685_v59 }
 0x257   : > { %v1908_v44 = vpop.eup %1342  ;;  %1354 = vpow2.f32 %v757_v63 }
 0x258   : > { %2434 = vst [vmem:[#allocation5_spill] sm:$0xff] %v1908_v44  ;;  %v857_v51 = vadd.f32 %v1908_v44, %v1906_v52  ;;  %v1914_v39 = vpop.eup %1344  ;;  %v687_v44 = vsub.f32 %v2436_v37, %v1885_v25  ;;  %1356 = vpow2.f32 %v761_v31 }
 0x259   : > { %v1919_v16 = vpop.eup %1346  ;;  %1358 = vpow2.f32 %v765_v1  ;;  %v697_v1 = vsub.f32 %v1714_v45, %v1885_v25 }
 0x25a   : > { %v858_v41 = vadd.f32 %v1914_v39, %v857_v51  ;;  %v1924_v36 = vpop.eup %1348  ;;  %v689_v51 = vsub.f32 %v1778_v13, %v1885_v25  ;;  %v773_v63 = vmul.f32 1.442695, %v687_v44  ;;  %1360 = vpow2.f32 %v769_v49 }
 0x25b   : > { %v1929_v56 = vpop.eup %1350  ;;  %v781_v44 = vmul.f32 1.442695, %v691_v60  ;;  %v2439_v60 = vld [vmem:[#allocation9_spill] sm:$0xff] }
 0x25c   : > { %v859_v26 = vadd.f32 %v1919_v16, %v858_v41  ;;  %v663_v41 = vrot.slane %v662_v33, 1  ;;  %v1934_v30 = vpop.eup %1352  ;;  %v777_v13 = vmul.f32 1.442695, %v689_v51  ;;  %1362 = vpow2.f32 %v773_v63 }
 0x25d   : > { %v1939_v24 = vpop.eup %1354  ;;  %v701_v63 = vsub.f32 %v2439_v60, %v1885_v25 }
 0x25e   : > { %v860_v40 = vadd.f32 %v1924_v36, %v859_v26  ;;  %v693_v26 = vsub.f32 %v1796_v22, %v1885_v25  ;;  %v1944_v31 = vmax.f32 %v662_v33, %v663_v41  ;;  %v1946_v37 = vpop.eup %1356  ;;  %v699_v22 = vsub.f32 %v1720_v48, %v1885_v25 }
 0x25f   : > { %1364 = vpow2.f32 %v777_v13  ;;  %v789_v41 = vmul.f32 1.442695, %v695_v18 }
 0x260   : > { %v861_v34 = vadd.f32 %v1929_v56, %v860_v40  ;;  %v785_v33 = vmul.f32 1.442695, %v693_v26  ;;  %v666_v49 = vsub.f32 %v1694_v35, %v1944_v31  ;;  %1366 = vpow2.f32 %v781_v44 }
 0x261   : > { %v668_v45 = vsub.f32 %v1700_v38, %v1944_v31  ;;  %v797_v26 = vmul.f32 1.442695, %v699_v22  ;;  %v670_v35 = vsub.f32 %v1706_v42, %v1944_v31  ;;  %v801_v22 = vmul.f32 1.442695, %v701_v63 }
 0x262   : > { %v862_v55 = vadd.f32 %v1934_v30, %v861_v34  ;;  %v1953_v34 = vpop.eup %1358  ;;  %1368 = vpow2.f32 %v785_v33 }
 0x263   : > { %2437 = vst [vmem:[#allocation7_spill] sm:$0xff] %v1953_v34  ;;  %v1960_v23 = vpop.eup %1360  ;;  %1370 = vpow2.f32 %v789_v41  ;;  %v2444_v41 = vld [vmem:[#allocation12_spill] sm:$0xff] }
 0x264   : > { %v863_v59 = vadd.f32 %v1939_v24, %v862_v55  ;;  %2438 = vst [vmem:[#allocation13_spill] sm:$0xff] %v1960_v23  ;;  %v793_v55 = vmul.f32 1.442695, %v697_v1  ;;  %v1967_v13 = vpop.eup %1362  ;;  %v2442_v1 = vld [vmem:[#allocation6_spill] sm:$0xff] }
 0x265   : > { %2440 = vst [vmem:[#allocation14_spill] sm:$0xff] %v1967_v13  ;;  %v1974_v38 = vpop.eup %1364  ;;  %v672_v60 = vsub.f32 %v2442_v1, %v1944_v31 }
 0x266   : > { %v864_v40 = vadd.f32 %v1946_v37, %v863_v59  ;;  %v2441_v59 = vld [vmem:[#allocation10_spill] sm:$0xff]  ;;  %1372 = vpow2.f32 %v793_v55  ;;  %v709_v55 = vsub.f32 %v1756_v2, %v1885_v25 }
 0x267   : > { %v703_v44 = vsub.f32 %v2441_v59, %v1885_v25  ;;  %1374 = vpow2.f32 %v797_v26  ;;  %v707_v59 = vsub.f32 %v2444_v41, %v1885_v25  ;;  %v743_v63 = vmul.f32 1.442695, %v672_v60 }
 0x268   : > { %v865_v51 = vadd.f32 %v1953_v34, %v864_v40  ;;  %v731_v40 = vmul.f32 1.442695, %v666_v49  ;;  %v1981_v34 = vpop.eup %1366  ;;  %v674_v49 = vsub.f32 %v1724_v50, %v1944_v31  ;;  %v715_v41 = vsub.f32 %v1780_v14, %v1885_v25 }
 0x269   : > { %v1988_v1 = vpop.eup %1368  ;;  %v813_v60 = vmul.f32 1.442695, %v707_v59  ;;  %v682_v59 = vsub.f32 %v1760_v4, %v1944_v31  ;;  %v684_v14 = vsub.f32 %v1768_v8, %v1944_v31 }
 0x26a   : > { %v866_v48 = vadd.f32 %v1960_v23, %v865_v51  ;;  %v735_v51 = vmul.f32 1.442695, %v668_v45  ;;  %v2443_v23 = vld [vmem:[#allocation11_spill] sm:$0xff]  ;;  %1376 = vpow2.f32 %v731_v40 }
 0x26b   : > { %v705_v33 = vsub.f32 %v2443_v23, %v1885_v25  ;;  %v676_v23 = vsub.f32 %v1732_v54, %v1944_v31  ;;  %v711_v54 = vsub.f32 %v1764_v6, %v1885_v25  ;;  %v763_v8 = vmul.f32 1.442695, %v682_v59 }
 0x26c   : > { %v867_v18 = vadd.f32 %v1967_v13, %v866_v48  ;;  %v739_v48 = vmul.f32 1.442695, %v670_v35  ;;  %v805_v13 = vmul.f32 1.442695, %v703_v44  ;;  %1378 = vpow2.f32 %v735_v51  ;;  %v1995_v35 = vpop.eup %1370 }
 0x26d   : > { %1380 = vpow2.f32 %v801_v22  ;;  %v809_v50 = vmul.f32 1.442695, %v705_v33  ;;  %v678_v44 = vsub.f32 %v1740_v58, %v1944_v31  ;;  %v1999_v40 = vpop.eup %1372  ;;  %v680_v33 = vsub.f32 %v1748_v62, %v1944_v31  ;;  %v2445_v58 = vld [vmem:[#allocation15_spill] sm:$0xff] }
 0x26e   : > { %v868_v42 = vadd.f32 %v1974_v38, %v867_v18  ;;  %1382 = vpow2.f32 %v739_v48  ;;  %v747_v18 = vmul.f32 1.442695, %v674_v49  ;;  %v2004_v51 = vpop.eup %1374  ;;  %v751_v22 = vmul.f32 1.442695, %v676_v23 }
 0x26f   : > { %1384 = vpow2.f32 %v805_v13  ;;  %v713_v49 = vsub.f32 %v2445_v58, %v1885_v25  ;;  %v817_v48 = vmul.f32 1.442695, %v709_v55  ;;  %v755_v62 = vmul.f32 1.442695, %v678_v44 }
 0x270   : > { %v869_v45 = vadd.f32 %v1981_v34, %v868_v42  ;;  %1386 = vpow2.f32 %v743_v63  ;;  %v2008_v42 = vpop.eup %1376  ;;  %v821_v23 = vmul.f32 1.442695, %v711_v54  ;;  %v759_v4 = vmul.f32 1.442695, %v680_v33 }
 0x271   : > { %1388 = vpow2.f32 %v809_v50  ;;  %v719_v58 = vsub.f32 %v1792_v20, %v1885_v25  ;;  %v829_v33 = vmul.f32 1.442695, %v715_v41  ;;  %v2450_v20 = vld [vmem:[#allocation16_spill] sm:$0xff] }
 0x272   : > { %v870_v26 = vadd.f32 %v1988_v1, %v869_v45  ;;  %v2013_v13 = vpop.eup %1378  ;;  %1390 = vpow2.f32 %v747_v18  ;;  %v825_v18 = vmul.f32 1.442695, %v713_v49 }
 0x273   : > { %v2019_v45 = vpop.eup %1380  ;;  %1392 = vpow2.f32 %v813_v60  ;;  %v894_v55 = vadd.f32 %v2013_v13, %v2008_v42 }
 0x274   : > { %v871_v2 = vadd.f32 %v1995_v35, %v870_v26  ;;  %v2024_v50 = vpop.eup %1382  ;;  %v717_v26 = vsub.f32 %v1786_v17, %v1885_v25  ;;  %1394 = vpow2.f32 %v751_v22  ;;  %v686_v17 = vsub.f32 %v1776_v12, %v1944_v31 }
 0x275   : > { %2446 = vst [vmem:[#allocation9_spill] sm:$0xff] %v2024_v50  ;;  %v2030_v44 = vpop.eup %1384  ;;  %1396 = vpow2.f32 %v817_v48  ;;  %v895_v60 = vadd.f32 %v2024_v50, %v894_v55  ;;  %v688_v50 = vsub.f32 %v2450_v20, %v1944_v31  ;;  %v767_v12 = vmul.f32 1.442695, %v684_v14 }
 0x276   : > { %v872_v6 = vadd.f32 %v1999_v40, %v871_v2  ;;  %v2034_v2 = vpop.eup %1386  ;;  %1398 = vpow2.f32 %v755_v62  ;;  %v833_v59 = vmul.f32 1.442695, %v717_v26  ;;  %v771_v20 = vmul.f32 1.442695, %v686_v17 }
 0x277   : > { %2447 = vst [vmem:[#allocation10_spill] sm:$0xff] %v2034_v2  ;;  %v2040_v22 = vpop.eup %1388  ;;  %1400 = vpow2.f32 %v821_v23  ;;  %v896_v48 = vadd.f32 %v2034_v2, %v895_v60  ;;  %v2451_v60 = vld [vmem:[#allocation19_spill] sm:$0xff]  ;;  %v837_v14 = vmul.f32 1.442695, %v719_v58 }
 0x278   : > { %v873_v63 = vadd.f32 %v2004_v51, %v872_v6  ;;  %v2044_v6 = vpop.eup %1390  ;;  %1402 = vpow2.f32 %v759_v4  ;;  %v723_v2 = vsub.f32 %v2451_v60, %v1885_v25  ;;  %v2452_v60 = vld [vmem:[#allocation18_spill] sm:$0xff] }
 0x279   : > { %2448 = vst [vmem:[#allocation6_spill] sm:$0xff] %v2044_v6  ;;  %v2050_v62 = vpop.eup %1392  ;;  %1404 = vpow2.f32 %v825_v18  ;;  %v897_v23 = vadd.f32 %v2044_v6, %v896_v48  ;;  %v725_v48 = vsub.f32 %v1836_v47, %v1885_v25  ;;  %v692_v6 = vsub.f32 %v2452_v60, %v1944_v31 }
 0x27a   : > { %v874_v54 = vadd.f32 %v2019_v45, %v873_v63  ;;  %v2449_v63 = vld [vmem:[#allocation17_spill] sm:$0xff]  ;;  %1406 = vpow2.f32 %v763_v8  ;;  %v694_v47 = vsub.f32 %v1830_v5, %v1944_v31 }
 0x27b   : > { %v721_v55 = vsub.f32 %v2449_v63, %v1885_v25  ;;  %v690_v63 = vsub.f32 %v1794_v21, %v1944_v31  ;;  %1408 = vpow2.f32 %v829_v33  ;;  %v775_v21 = vmul.f32 1.442695, %v688_v50 }
 0x27c   : > { %v875_v49 = vadd.f32 %v2030_v44, %v874_v54  ;;  %v2054_v54 = vpop.eup %1394  ;;  %1410 = vpow2.f32 %v767_v12  ;;  %v845_v50 = vmul.f32 1.442695, %v723_v2  ;;  %v849_v5 = vmul.f32 1.442695, %v725_v48 }
 0x27d   : > { %v2060_v4 = vpop.eup %1396  ;;  %v898_v18 = vadd.f32 %v2054_v54, %v897_v23  ;;  %1412 = vpow2.f32 %v833_v59  ;;  %v841_v17 = vmul.f32 1.442695, %v721_v55  ;;  %v727_v23 = vsub.f32 %v1859_v32, %v1885_v25 }
 0x27e   : > { %v876_v41 = vadd.f32 %v2040_v22, %v875_v49  ;;  %v2064_v49 = vpop.eup %1398  ;;  %1414 = vpow2.f32 %v771_v20  ;;  %v779_v60 = vmul.f32 1.442695, %v690_v63  ;;  %v783_v32 = vmul.f32 1.442695, %v692_v6 }
 0x27f   : > { %v2070_v8 = vpop.eup %1400  ;;  %v899_v33 = vadd.f32 %v2064_v49, %v898_v18  ;;  %1416 = vpow2.f32 %v837_v14  ;;  %v696_v18 = vsub.f32 %v1857_v10, %v1944_v31  ;;  %v698_v14 = vsub.f32 %v1716_v46, %v1944_v31 }
 0x280   : > { %v877_v26 = vadd.f32 %v2050_v62, %v876_v41  ;;  %v2074_v41 = vpop.eup %1402  ;;  %1418 = vpow2.f32 %v775_v21  ;;  %v853_v10 = vmul.f32 1.442695, %v727_v23  ;;  %v702_v23 = vsub.f32 %v1730_v53, %v1944_v31 }
 0x281   : > { %v2080_v12 = vpop.eup %1404  ;;  %v900_v59 = vadd.f32 %v2074_v41, %v899_v33  ;;  %1420 = vpow2.f32 %v841_v17  ;;  %v2454_v17 = vld [vmem:[#allocation8_spill] sm:$0xff] }
 0x282   : > { %v878_v58 = vadd.f32 %v2060_v4, %v877_v26  ;;  %v2084_v26 = vpop.eup %1406  ;;  %1422 = vpow2.f32 %v779_v60 }
 0x283   : > { %2453 = vst [vmem:[#allocation11_spill] sm:$0xff] %v2084_v26  ;;  %v2088_v25 = vpop.eup %1408  ;;  %v901_v20 = vadd.f32 %v2084_v26, %v900_v59  ;;  %1424 = vpow2.f32 %v845_v50  ;;  %v791_v59 = vmul.f32 1.442695, %v696_v18  ;;  %v795_v50 = vmul.f32 1.442695, %v698_v14 }
 0x284   : > { %v879_v55 = vadd.f32 %v2070_v8, %v878_v58  ;;  %v2092_v2 = vpop.eup %1410  ;;  %v787_v58 = vmul.f32 1.442695, %v694_v47  ;;  %1426 = vpow2.f32 %v783_v32 }
 0x285   : > { %v2096_v33 = vpop.eup %1412  ;;  %v902_v21 = vadd.f32 %v2092_v2, %v901_v20  ;;  %1428 = vpow2.f32 %v849_v5  ;;  %v704_v5 = vsub.f32 %v1738_v57, %v1944_v31 }
 0x286   : > { %v880_v63 = vadd.f32 %v2080_v12, %v879_v55  ;;  %v2100_v48 = vpop.eup %1414  ;;  %v700_v55 = vsub.f32 %v2454_v17, %v1944_v31  ;;  %1430 = vpow2.f32 %v787_v58  ;;  %v803_v17 = vmul.f32 1.442695, %v702_v23 }
 0x287   : > { %v2104_v26 = vpop.eup %1416  ;;  %v903_v47 = vadd.f32 %v2100_v48, %v902_v21  ;;  %1432 = vpow2.f32 %v853_v10  ;;  %v706_v10 = vsub.f32 %v1746_v61, %v1944_v31 }
 0x288   : > { %v881_v6 = vadd.f32 %v2088_v25, %v880_v63  ;;  %v2108_v60 = vpop.eup %1418  ;;  %1434 = vpow2.f32 %v791_v59  ;;  %v708_v59 = vsub.f32 %v1752_v0, %v1944_v31 }
 0x289   : > { %v2112_v63 = vpop.eup %1420  ;;  %v904_v18 = vadd.f32 %v2108_v60, %v903_v47  ;;  %1436 = vpow2.f32 %v795_v50  ;;  %v811_v50 = vmul.f32 1.442695, %v706_v10 }
 0x28a   : > { %v882_v46 = vadd.f32 %v2096_v33, %v881_v6  ;;  %v2116_v20 = vpop.eup %1422  ;;  %v799_v6 = vmul.f32 1.442695, %v700_v55 }
 0x28b   : > { %2455 = vst [vmem:[#allocation12_spill] sm:$0xff] %v2116_v20  ;;  %v2120_v21 = vpop.eup %1424  ;;  %v905_v14 = vadd.f32 %v2116_v20, %v904_v18 }
 0x28c   : > { %v883_v32 = vadd.f32 %v2104_v26, %v882_v46  ;;  %v2124_v58 = vpop.eup %1426  ;;  %1438 = vpow2.f32 %v799_v6 }
 0x28d   : > { %2456 = vst [vmem:[#allocation15_spill] sm:$0xff] %v2124_v58  ;;  %v2128_v46 = vpop.eup %1428  ;;  %v906_v57 = vadd.f32 %v2124_v58, %v905_v14  ;;  %1440 = vpow2.f32 %v803_v17  ;;  %v710_v14 = vsub.f32 %v1758_v3, %v1944_v31 }
 0x28e   : > { %v884_v53 = vadd.f32 %v2112_v63, %v883_v32  ;;  %v2132_v55 = vpop.eup %1430  ;;  %v807_v32 = vmul.f32 1.442695, %v704_v5  ;;  %v815_v5 = vmul.f32 1.442695, %v708_v59  ;;  %v716_v59 = vsub.f32 %v1782_v15, %v1944_v31 }
 0x28f   : > { %2457 = vst [vmem:[#allocation17_spill] sm:$0xff] %v2132_v55  ;;  %v2136_v18 = vpop.eup %1432  ;;  %v907_v61 = vadd.f32 %v2132_v55, %v906_v57  ;;  %v819_v3 = vmul.f32 1.442695, %v710_v14 }
 0x290   : > { %v885_v47 = vadd.f32 %v2120_v21, %v884_v53  ;;  %v2140_v23 = vpop.eup %1434  ;;  %1442 = vpow2.f32 %v807_v32 }
 0x291   : > { %v908_v58 = vadd.f32 %v2140_v23, %v907_v61  ;;  %v2146_v0 = vpop.eup %1436  ;;  %1444 = vpow2.f32 %v811_v50  ;;  %v718_v50 = vsub.f32 %v1790_v19, %v1944_v31 }
 0x292   : > { %v886_v20 = vadd.f32 %v2128_v46, %v885_v47  ;;  %2458 = vst [vmem:[#allocation16_spill] sm:$0xff] %v2146_v0  ;;  %v712_v47 = vsub.f32 %v1766_v7, %v1944_v31  ;;  %v2151_v55 = vpop.eup %1438  ;;  %1446 = vpow2.f32 %v815_v5 }
 0x293   : > { %v909_v57 = vadd.f32 %v2146_v0, %v908_v58  ;;  %2459 = vst [vmem:[#allocation19_spill] sm:$0xff] %v2151_v55  ;;  %v2156_v61 = vpop.eup %1440  ;;  %1448 = vpow2.f32 %v819_v3  ;;  %v835_v19 = vmul.f32 1.442695, %v718_v50  ;;  %v722_v3 = vsub.f32 %v1824_v29, %v1944_v31 }
 0x294   : > { %v887_v53 = vadd.f32 %v2136_v18, %v886_v20  ;;  %v714_v20 = vsub.f32 %v1774_v11, %v1944_v31  ;;  %2460 = vst [vmem:[#allocation18_spill] sm:$0xff] %v2156_v61  ;;  %v823_v7 = vmul.f32 1.442695, %v712_v47  ;;  %v720_v47 = vsub.f32 %v1804_v27, %v1944_v31 }
 0x295   : > { %v910_v17 = vadd.f32 %v2151_v55, %v909_v57  ;;  %v831_v57 = vmul.f32 1.442695, %v716_v59  ;;  %v724_v50 = vsub.f32 %v1847_v9, %v1944_v31  ;;  %v726_v9 = vsub.f32 %v1869_v28, %v1944_v31 }
 0x296   : > { %v888_v6 = vrot.slane %v887_v53, 4  ;;  %v2161_v0 = vpop.eup %1442  ;;  %v827_v11 = vmul.f32 1.442695, %v714_v20  ;;  %1450 = vpow2.f32 %v823_v7  ;;  %v839_v59 = vmul.f32 1.442695, %v720_v47 }
 0x297   : > { %v911_v58 = vadd.f32 %v2156_v61, %v910_v17  ;;  %2461 = vst [vmem:[#allocation8_spill] sm:$0xff] %v2161_v0 }
 0x298   : > { %v889_v10 = vadd.f32 %v888_v6, %v887_v53  ;;  %v2166_v6 = vpop.eup %1444  ;;  %1452 = vpow2.f32 %v827_v11 }
 0x299   : > { %v912_v14 = vadd.f32 %v2161_v0, %v911_v58  ;;  %2462 = vst [vmem:[#allocation20_spill] sm:$0xff] %v2166_v6  ;;  %v2169_v5 = vpop.eup %1446  ;;  %1454 = vpow2.f32 %v831_v57 }
 0x29a   : > { %v890_v32 = vrot.slane %v889_v10, 2  ;;  %2463 = vst [vmem:[#allocation21_spill] sm:$0xff] %v2169_v5  ;;  %v2174_v20 = vpop.eup %1448 }
 0x29b   : > { %v913_v15 = vadd.f32 %v2166_v6, %v912_v14 }
 0x29c   : > { %v891_v53 = vadd.f32 %v890_v32, %v889_v10  ;;  %v2179_v7 = vpop.eup %1450 }
 0x29d   : > { %v914_v10 = vadd.f32 %v2169_v5, %v913_v15 }
 0x29e   : > { %v892_v55 = vrot.slane %v891_v53, 1 }
 0x29f   : > { %v915_v32 = vadd.f32 %v2174_v20, %v914_v10 }
 0x2a0   : > { %v893_v17 = vadd.f32 %v892_v55, %v891_v53  ;;  %v2182_v55 = vpop.eup %1452  ;;  %v843_v53 = vmul.f32 1.442695, %v722_v3 }
 0x2a1   : > { %v916_v27 = vadd.f32 %v2179_v7, %v915_v32  ;;  %v2184_v58 = vpop.eup %1454 }
 0x2a2   : > { %1456 = vrcp.f32 %v893_v17  ;;  %v942_v32 = vand.u32 2147483648, %v893_v17  ;;  %vm936_vm3 = vweird.f32 %v893_v17 }
 0x2a3   : > { %1458 = vpow2.f32 %v835_v19  ;;  %v917_v29 = vadd.f32 %v2182_v55, %v916_v27  ;;  %v847_v19 = vmul.f32 1.442695, %v724_v50  ;;  %v940_v27 = vand.u32 2147483647, %v893_v17 }
 0x2a4   : > { %1460 = vpow2.f32 %v839_v59 }
 0x2a5   : > { %v918_v57 = vadd.f32 %v2184_v58, %v917_v29  ;;  %1462 = vpow2.f32 %v843_v53  ;;  %v728_v29 = vsub.f32 %v1881_v43, %v1944_v31  ;;  %v943_v53 = vor.u32 1.1754944e-38, %v942_v32 }
 0x2a6   : > { %1464 = vpow2.f32 %v847_v19  ;;  %vm941_vm5 = vcmp.eq.f32.partialorder %v940_v27, 8.507059e+37  ;;  %v2466_v27 = vld [vmem:[#allocation13_spill] sm:$0xff] }
 0x2a8   : > { %v1457_v11 = vpop.eup %1456 }
 0x2a9   : > { %v932_v14 = vmul.f32 %v1457_v11, %v893_v17  ;;  %v2190_v15 = vpop.eup %1458  ;;  %vm937_vm2 = vweird.f32 %v1457_v11 }
 0x2aa   : > { %v919_v10 = vadd.f32 %v2190_v15, %v918_v57  ;;  %v2196_v3 = vpop.eup %1460  ;;  %vm938_vm4 = vmor %vm936_vm3, %vm937_vm2 }
 0x2ab   : > { %v933_v47 = vsub.f32 1.0, %v932_v14  ;;  %v851_v14 = vmul.f32 1.442695, %v726_v9  ;;  %v2203_v57 = vpop.eup %1462 }
 0x2ac   : > { %v920_v5 = vadd.f32 %v2196_v3, %v919_v10  ;;  %v2464_v10 = vld [vmem:[#allocation5_spill] sm:$0xff]  ;;  %v2210_v19 = vpop.eup %1464 }
 0x2ad   : > { %v934_v59 = vmul.f32 %v1457_v11, %v933_v47  ;;  %v855_v47 = vmul.f32 1.442695, %v728_v29  ;;  %1466 = vpow2.f32 %v851_v14 }
 0x2ae   : > { %v921_v0 = vadd.f32 %v2203_v57, %v920_v5 }
 0x2af   : > { %v935_v50 = vadd.f32 %v1457_v11, %v934_v59  ;;  %1468 = vpow2.f32 %v855_v47 }
 0x2b1   : > { %v939_v28 = vsel %vm938_vm4, %v1457_v11, %v935_v50 }
 0x2b2   : > { %v944_v6 = vsel %vm941_vm5, %v943_v53, %v939_v28 }
 0x2b3   : > { %v1021_v43 = vmul.f32 %v2136_v18, %v944_v6  ;;  %v959_v31 = vmul.f32 %v1906_v52, %v944_v6  ;;  %v961_v61 = vmul.f32 %v2464_v10, %v944_v6  ;;  %v963_v17 = vmul.f32 %v1914_v39, %v944_v6 }
 0x2b4   : > { %v965_v11 = vmul.f32 %v1919_v16, %v944_v6  ;;  %v967_v18 = vmul.f32 %v1924_v36, %v944_v6  ;;  %v969_v52 = vmul.f32 %v1929_v56, %v944_v6  ;;  %v971_v5 = vmul.f32 %v1934_v30, %v944_v6 }
 0x2b5   : > { %1085 = vst [vmem:[%s2212_s5 + $0x1f0] sm:$0xff] %v1021_v43  ;;  %v922_v39 = vadd.f32 %v2210_v19, %v921_v0  ;;  %v973_v32 = vmul.f32 %v1939_v24, %v944_v6  ;;  %v975_v9 = vmul.f32 %v1946_v37, %v944_v6  ;;  %v993_v59 = vmul.f32 %v2004_v51, %v944_v6 }
 0x2b6   : > { %1023 = vst [vmem:[%s2212_s5] sm:$0xff] %v959_v31  ;;  %v995_v16 = vmul.f32 %v2019_v45, %v944_v6  ;;  %v997_v36 = vmul.f32 %v2030_v44, %v944_v6  ;;  %v999_v56 = vmul.f32 %v2040_v22, %v944_v6  ;;  %v1001_v30 = vmul.f32 %v2050_v62, %v944_v6  ;;  %v2236_v44 = vpop.eup %1466 }
 0x2b7   : > { %1025 = vst [vmem:[%s2212_s5 + $0x10] sm:$0xff] %v961_v61  ;;  %v1003_v0 = vmul.f32 %v2060_v4, %v944_v6  ;;  %v1005_v24 = vmul.f32 %v2070_v8, %v944_v6  ;;  %v1007_v37 = vmul.f32 %v2080_v12, %v944_v6  ;;  %v1009_v51 = vmul.f32 %v2088_v25, %v944_v6  ;;  %v1469_v12 = vpop.eup %1468  ;;  %v2465_v25 = vld [vmem:[#allocation7_spill] sm:$0xff] }
 0x2b8   : > { %1027 = vst [vmem:[%s2212_s5 + $0x20] sm:$0xff] %v963_v17  ;;  %v1011_v45 = vmul.f32 %v2096_v33, %v944_v6  ;;  %v1013_v22 = vmul.f32 %v2104_v26, %v944_v6  ;;  %v1015_v62 = vmul.f32 %v2112_v63, %v944_v6  ;;  %v1017_v4 = vmul.f32 %v2120_v21, %v944_v6  ;;  %v2467_v26 = vld [vmem:[#allocation14_spill] sm:$0xff] }
 0x2b9   : > { %1029 = vst [vmem:[%s2212_s5 + $0x30] sm:$0xff] %v965_v11  ;;  %v1019_v8 = vmul.f32 %v2128_v46, %v944_v6  ;;  %v977_v61 = vmul.f32 %v2465_v25, %v944_v6  ;;  %v923_v33 = vadd.f32 %v2236_v44, %v922_v39  ;;  %v979_v29 = vmul.f32 %v2466_v27, %v944_v6  ;;  %v2477_v27 = vld [vmem:[#allocation18_spill] sm:$0xff] }
 0x2ba   : > { %1031 = vst [vmem:[%s2212_s5 + $0x40] sm:$0xff] %v967_v18  ;;  %v981_v63 = vmul.f32 %v2467_v26, %v944_v6  ;;  %v983_v46 = vmul.f32 %v1974_v38, %v944_v6  ;;  %v985_v50 = vmul.f32 %v1981_v34, %v944_v6  ;;  %v987_v14 = vmul.f32 %v1988_v1, %v944_v6  ;;  %v2478_v26 = vld [vmem:[#allocation8_spill] sm:$0xff] }
 0x2bb   : > { %1033 = vst [vmem:[%s2212_s5 + $0x50] sm:$0xff] %v969_v52  ;;  %v924_v21 = vadd.f32 %v1469_v12, %v923_v33  ;;  %v989_v28 = vmul.f32 %v1995_v35, %v944_v6  ;;  %v991_v38 = vmul.f32 %v1999_v40, %v944_v6 }
 0x2bc   : > { %1035 = vst [vmem:[%s2212_s5 + $0x60] sm:$0xff] %v971_v5 }
 0x2bd   : > { %1037 = vst [vmem:[%s2212_s5 + $0x70] sm:$0xff] %v973_v32  ;;  %v925_v53 = vrot.slane %v924_v21, 4 }
 0x2be   : > { %1039 = vst [vmem:[%s2212_s5 + $0x80] sm:$0xff] %v975_v9 }
 0x2bf   : > { %1041 = vst [vmem:[%s2212_s5 + $0x90] sm:$0xff] %v977_v61  ;;  %v926_v47 = vadd.f32 %v925_v53, %v924_v21  ;;  %v2476_v61 = vld [vmem:[#allocation19_spill] sm:$0xff] }
 0x2c0   : > { %1043 = vst [vmem:[%s2212_s5 + $0xa0] sm:$0xff] %v979_v29 }
 0x2c1   : > { %1045 = vst [vmem:[%s2212_s5 + $0xb0] sm:$0xff] %v981_v63  ;;  %v927_v34 = vrot.slane %v926_v47, 2 }
 0x2c2   : > { %1047 = vst [vmem:[%s2212_s5 + $0xc0] sm:$0xff] %v983_v46  ;;  %v2480_v46 = vld [vmem:[#allocation21_spill] sm:$0xff] }
 0x2c3   : > { %1049 = vst [vmem:[%s2212_s5 + $0xd0] sm:$0xff] %v985_v50  ;;  %v928_v1 = vadd.f32 %v927_v34, %v926_v47 }
 0x2c4   : > { %1051 = vst [vmem:[%s2212_s5 + $0xe0] sm:$0xff] %v987_v14 }
 0x2c5   : > { %1053 = vst [vmem:[%s2212_s5 + $0xf0] sm:$0xff] %v989_v28  ;;  %v929_v35 = vrot.slane %v928_v1, 1 }
 0x2c6   : > { %1055 = vst [vmem:[%s2212_s5 + $0x100] sm:$0xff] %v991_v38 }
 0x2c7   : > { %1057 = vst [vmem:[%s2212_s5 + $0x110] sm:$0xff] %v993_v59  ;;  %v930_v43 = vadd.f32 %v929_v35, %v928_v1 }
 0x2c8   : > { %1059 = vst [vmem:[%s2212_s5 + $0x120] sm:$0xff] %v995_v16  ;;  %v2468_v16 = vld [vmem:[#allocation9_spill] sm:$0xff] }
 0x2c9   : > { %1061 = vst [vmem:[%s2212_s5 + $0x130] sm:$0xff] %v997_v36  ;;  %1470 = vrcp.f32 %v930_v43  ;;  %v956_v10 = vand.u32 2147483648, %v930_v43  ;;  %v954_v11 = vand.u32 2147483647, %v930_v43  ;;  %vm950_vm7 = vweird.f32 %v930_v43 }
 0x2ca   : > { %1063 = vst [vmem:[%s2212_s5 + $0x140] sm:$0xff] %v999_v56  ;;  %v2469_v56 = vld [vmem:[#allocation10_spill] sm:$0xff] }
 0x2cb   : > { %1065 = vst [vmem:[%s2212_s5 + $0x150] sm:$0xff] %v1001_v30  ;;  %v957_v52 = vor.u32 1.1754944e-38, %v956_v10  ;;  %vm955_vm9 = vcmp.eq.f32.partialorder %v954_v11, 8.507059e+37 }
 0x2cc   : > { %1067 = vst [vmem:[%s2212_s5 + $0x160] sm:$0xff] %v1003_v0  ;;  %v2470_v0 = vld [vmem:[#allocation6_spill] sm:$0xff] }
 0x2cd   : > { %1069 = vst [vmem:[%s2212_s5 + $0x170] sm:$0xff] %v1005_v24 }
 0x2ce   : > { %1071 = vst [vmem:[%s2212_s5 + $0x180] sm:$0xff] %v1007_v37 }
 0x2cf   : > { %1073 = vst [vmem:[%s2212_s5 + $0x190] sm:$0xff] %v1009_v51  ;;  %v1471_v40 = vpop.eup %1470 }
 0x2d0   : > { %1075 = vst [vmem:[%s2212_s5 + $0x1a0] sm:$0xff] %v1011_v45  ;;  %v946_v6 = vmul.f32 %v1471_v40, %v930_v43  ;;  %vm951_vm6 = vweird.f32 %v1471_v40  ;;  %v2471_v45 = vld [vmem:[#allocation11_spill] sm:$0xff] }
 0x2d1   : > { %1077 = vst [vmem:[%s2212_s5 + $0x1b0] sm:$0xff] %v1013_v22  ;;  %vm952_vm8 = vmor %vm950_vm7, %vm951_vm6 }
 0x2d2   : > { %1079 = vst [vmem:[%s2212_s5 + $0x1c0] sm:$0xff] %v1015_v62  ;;  %v947_v31 = vsub.f32 1.0, %v946_v6 }
 0x2d3   : > { %1081 = vst [vmem:[%s2212_s5 + $0x1d0] sm:$0xff] %v1017_v4 }
 0x2d4   : > { %1083 = vst [vmem:[%s2212_s5 + $0x1e0] sm:$0xff] %v1019_v8  ;;  %v948_v17 = vmul.f32 %v1471_v40, %v947_v31 }
 0x2d6   : > { %v949_v18 = vadd.f32 %v1471_v40, %v948_v17 }
 0x2d8   : > { %v953_v5 = vsel %vm952_vm8, %v1471_v40, %v949_v18 }
 0x2d9   : > { %v958_v39 = vsel %vm955_vm9, %v957_v52, %v953_v5 }
 0x2da   : > { %v1022_v32 = vmul.f32 %v1469_v12, %v958_v39  ;;  %v960_v9 = vmul.f32 %v2008_v42, %v958_v39  ;;  %v962_v59 = vmul.f32 %v2013_v13, %v958_v39  ;;  %v964_v36 = vmul.f32 %v2468_v16, %v958_v39 }
 0x2db   : > { %v966_v30 = vmul.f32 %v2469_v56, %v958_v39  ;;  %v968_v24 = vmul.f32 %v2470_v0, %v958_v39  ;;  %v970_v37 = vmul.f32 %v2054_v54, %v958_v39  ;;  %v972_v51 = vmul.f32 %v2064_v49, %v958_v39 }
 0x2dc   : > { %1086 = vst [vmem:[%s2212_s5 + $0x1f8] sm:$0xff] %v1022_v32  ;;  %v974_v42 = vmul.f32 %v2074_v41, %v958_v39  ;;  %v976_v13 = vmul.f32 %v2471_v45, %v958_v39  ;;  %v1004_v22 = vmul.f32 %v2174_v20, %v958_v39  ;;  %v1006_v62 = vmul.f32 %v2179_v7, %v958_v39 }
 0x2dd   : > { %1024 = vst [vmem:[%s2212_s5 + $0x8] sm:$0xff] %v960_v9  ;;  %v1008_v4 = vmul.f32 %v2182_v55, %v958_v39  ;;  %v1010_v54 = vmul.f32 %v2184_v58, %v958_v39  ;;  %v1012_v8 = vmul.f32 %v2190_v15, %v958_v39  ;;  %v1014_v49 = vmul.f32 %v2196_v3, %v958_v39  ;;  %v2472_v15 = vld [vmem:[#allocation12_spill] sm:$0xff] }
 0x2de   : > { %1026 = vst [vmem:[%s2212_s5 + $0x18] sm:$0xff] %v962_v59  ;;  %v1016_v41 = vmul.f32 %v2203_v57, %v958_v39  ;;  %v1018_v20 = vmul.f32 %v2210_v19, %v958_v39  ;;  %v1020_v12 = vmul.f32 %v2236_v44, %v958_v39  ;;  %v978_v7 = vmul.f32 %v2092_v2, %v958_v39  ;;  %v2473_v57 = vld [vmem:[#allocation15_spill] sm:$0xff]  ;;  %v2474_v44 = vld [vmem:[#allocation17_spill] sm:$0xff] }
 0x2df   : > { %1028 = vst [vmem:[%s2212_s5 + $0x28] sm:$0xff] %v964_v36  ;;  %v980_v55 = vmul.f32 %v2100_v48, %v958_v39  ;;  %v982_v58 = vmul.f32 %v2108_v60, %v958_v39  ;;  %v984_v3 = vmul.f32 %v2472_v15, %v958_v39  ;;  %v986_v19 = vmul.f32 %v2473_v57, %v958_v39  ;;  %v2475_v60 = vld [vmem:[#allocation16_spill] sm:$0xff] }
 0x2e0   : > { %1030 = vst [vmem:[%s2212_s5 + $0x38] sm:$0xff] %v966_v30  ;;  %v988_v2 = vmul.f32 %v2474_v44, %v958_v39  ;;  %v990_v48 = vmul.f32 %v2140_v23, %v958_v39  ;;  %v992_v25 = vmul.f32 %v2475_v60, %v958_v39  ;;  %v994_v33 = vmul.f32 %v2476_v61, %v958_v39  ;;  %v2479_v23 = vld [vmem:[#allocation20_spill] sm:$0xff] }
 0x2e1   : > { %1032 = vst [vmem:[%s2212_s5 + $0x48] sm:$0xff] %v968_v24  ;;  %v996_v29 = vmul.f32 %v2477_v27, %v958_v39  ;;  %v998_v63 = vmul.f32 %v2478_v26, %v958_v39  ;;  %v1000_v21 = vmul.f32 %v2479_v23, %v958_v39  ;;  %v1002_v50 = vmul.f32 %v2480_v46, %v958_v39 }
 0x2e2   : > { %1034 = vst [vmem:[%s2212_s5 + $0x58] sm:$0xff] %v970_v37 }
 0x2e3   : > { %1036 = vst [vmem:[%s2212_s5 + $0x68] sm:$0xff] %v972_v51 }
 0x2e4   : > { %1038 = vst [vmem:[%s2212_s5 + $0x78] sm:$0xff] %v974_v42 }
 0x2e5   : > { %1040 = vst [vmem:[%s2212_s5 + $0x88] sm:$0xff] %v976_v13 }
 0x2e6   : > { %1042 = vst [vmem:[%s2212_s5 + $0x98] sm:$0xff] %v978_v7 }
 0x2e7   : > { %1044 = vst [vmem:[%s2212_s5 + $0xa8] sm:$0xff] %v980_v55 }
 0x2e8   : > { %1046 = vst [vmem:[%s2212_s5 + $0xb8] sm:$0xff] %v982_v58 }
 0x2e9   : > { %1048 = vst [vmem:[%s2212_s5 + $0xc8] sm:$0xff] %v984_v3 }
 0x2ea   : > { %1050 = vst [vmem:[%s2212_s5 + $0xd8] sm:$0xff] %v986_v19 }
 0x2eb   : > { %1052 = vst [vmem:[%s2212_s5 + $0xe8] sm:$0xff] %v988_v2 }
 0x2ec   : > { %1054 = vst [vmem:[%s2212_s5 + $0xf8] sm:$0xff] %v990_v48 }
 0x2ed   : > { %1056 = vst [vmem:[%s2212_s5 + $0x108] sm:$0xff] %v992_v25 }
 0x2ee   : > { %1058 = vst [vmem:[%s2212_s5 + $0x118] sm:$0xff] %v994_v33 }
 0x2ef   : > { %1060 = vst [vmem:[%s2212_s5 + $0x128] sm:$0xff] %v996_v29 }
 0x2f0   : > { %1062 = vst [vmem:[%s2212_s5 + $0x138] sm:$0xff] %v998_v63 }
 0x2f1   : > { %1064 = vst [vmem:[%s2212_s5 + $0x148] sm:$0xff] %v1000_v21 }
 0x2f2   : > { %1066 = vst [vmem:[%s2212_s5 + $0x158] sm:$0xff] %v1002_v50 }
 0x2f3   : > { %1068 = vst [vmem:[%s2212_s5 + $0x168] sm:$0xff] %v1004_v22 }
 0x2f4   : > { %1070 = vst [vmem:[%s2212_s5 + $0x178] sm:$0xff] %v1006_v62 }
 0x2f5   : > { %1072 = vst [vmem:[%s2212_s5 + $0x188] sm:$0xff] %v1008_v4 }
 0x2f6   : > { %1074 = vst [vmem:[%s2212_s5 + $0x198] sm:$0xff] %v1010_v54 }
 0x2f7   : > { %1076 = vst [vmem:[%s2212_s5 + $0x1a8] sm:$0xff] %v1012_v8 }
 0x2f8   : > { %1078 = vst [vmem:[%s2212_s5 + $0x1b8] sm:$0xff] %v1014_v49 }
 0x2f9   : > { %1080 = vst [vmem:[%s2212_s5 + $0x1c8] sm:$0xff] %v1016_v41 }
 0x2fa   : > { %1082 = vst [vmem:[%s2212_s5 + $0x1d8] sm:$0xff] %v1018_v20 }
 0x2fb   : > { %1084 = vst [vmem:[%s2212_s5 + $0x1e8] sm:$0xff] %v1020_v12 }
 0x2fc   : > { %1499 = shalt.err (!%p1496_p5)
}
 0x2fd   : > { %s1552_s29 = smov 256   ;;  %s1553_s30 = smov 16  }
 0x2fe   : > { %1282 = dma.vmem_to_hbm [thread:$0]  (%p1609_p4), %s1103_s16, 8192, %s1105_s18, %s1088_s12, %s1552_s29, %s1552_s29, %s1553_s30  }
 0x2ff PF: > { %p1288_p6 = scmp.ge.s32.totalorder %s1550_s14, 2  ;;  %s1119_s3 = sand.u32 1, %s1530_s9  }
 0x300   : > { %s1120_s4 = scalar_lea.sflag [#allocation3], %s1119_s3 }
 0x301   : > { %p1285_p7 = pnand %p1288_p6, %p1616_p8 }
 0x303   : > { %p1286_p9 = pneg %p1285_p7 }
 0x305   : > { %1525 = dma.done.wait (%p1286_p9), %s1120_s4, 8192  }
 0x306   : > { %1527 = vsyncadd (%p1286_p9), %s1120_s4, 4294959104  ;;  %s15_s14 = sadd.s32 1, %s1550_s14   ;;  %s2481_s9 = smov %s1534_s10 }
 0x307   : > { %p12_p10 = scmp.ge.s32.totalorder %s15_s14, 4   ;;  %s2482_s10 = smov %s1538_s11 }
 0x308   : > { %s2483_s11 = smov %s1622_s22  ;;  %s2484_s12 = smov %s1546_s13 }
 0x309   : > { %s2485_s13 = smov %s2487_s17  ;;  %14 = sbr.rel (!%p12_p10) target bundleno = 4 (0x4), region = 66 }
 0x30e   :  { %1126 = vsyncpa [#allocation3], 1 }
 0x30f   :  { %1128 = vsyncpa [#allocation3 + $0x1], 1 }

</bundles_post_ra>
